<compile_context>
chip_gen: v6e
topology: v6e:2x2x1
jax: 0.10.0
libtpu: 0.0.40
codegen_flags: <defaults>
</compile_context>

<pallas_src>
import jax
import jax.numpy as jnp
from jax.experimental import pallas as pl
from jax.experimental.pallas import tpu as pltpu


def _round_up(n: int, m: int) -> int:
    return ((n + m - 1) // m) * m


def policy_net_kernel(x_ref, w1_ref, b1_ref, w2_ref, b2_ref, w3_ref, b3_ref, out_ref):
    # fc1 + tanh : bf16 MXU operands, f32 accumulate, f32 tanh (v5e-safe path)
    x = x_ref[...].astype(jnp.bfloat16)                                   # [TB, 8]
    h1 = jnp.dot(x, w1_ref[...], preferred_element_type=jnp.float32) + b1_ref[...]
    h1 = jnp.tanh(h1)                                                     # [TB, 256] f32

    # fc2 + tanh
    h2 = jnp.dot(h1.astype(jnp.bfloat16), w2_ref[...],
                 preferred_element_type=jnp.float32) + b2_ref[...]
    h2 = jnp.tanh(h2)                                                     # [TB, 256] f32

    # fc3
    logits = jnp.dot(h2.astype(jnp.bfloat16), w3_ref[...],
                     preferred_element_type=jnp.float32) + b3_ref[...]    # [TB, 4]

    # softmax along last dim (f32); divide goes to the otherwise-idle EUP slot
    m = jnp.max(logits, axis=-1, keepdims=True)
    e = jnp.exp(logits - m)
    s = jnp.sum(e, axis=-1, keepdims=True)
    out_ref[...] = (e * pl.reciprocal(s, approx=True)).astype(out_ref.dtype)


def policy_gradient_network(x, params, *, tb=512):
    """x: [B, 8] float32 -> [B, 4] float32 softmax probabilities."""
    w1, b1, w2, b2, w3, b3 = params
    B, d_in = x.shape
    assert d_in == w1.shape[0]
    d_h = w1.shape[1]
    d_out = w3.shape[1]

    # bf16 weights shrink the HBM->VMEM DMA (w2 dominates) and feed the MXU at
    # native rate.  Biases stay f32 (tiny; keeps the adds exact).
    w1 = w1.astype(jnp.bfloat16)
    w2 = w2.astype(jnp.bfloat16)
    w3 = w3.astype(jnp.bfloat16)

    # Batch tile: multiple of 8 (sublane), capped at `tb`.  Pad batch so it
    # divides evenly; padded rows are sliced off after the call.
    tb = max(8, _round_up(min(tb, B), 8))
    bp = _round_up(B, tb)
    if bp != B:
        x = jnp.pad(x, ((0, bp - B), (0, 0)))

    grid = (bp // tb,)

    flops = 2 * bp * (d_in * d_h + d_h * d_h + d_h * d_out)
    bytes_accessed = (
        x.size * x.dtype.itemsize
        + sum(a.size * a.dtype.itemsize for a in (w1, b1, w2, b2, w3, b3))
        + bp * d_out * 4
    )
    cost = pl.CostEstimate(
        flops=flops,
        transcendentals=bp * (2 * d_h + d_out),
        bytes_accessed=bytes_accessed,
    )

    out = pl.pallas_call(
        policy_net_kernel,
        out_shape=jax.ShapeDtypeStruct((bp, d_out), jnp.float32),
        grid_spec=pltpu.PrefetchScalarGridSpec(
            num_scalar_prefetch=0,
            grid=grid,
            in_specs=[
                pl.BlockSpec((tb, d_in), lambda i: (i, 0)),       # x: tiled on batch
                pl.BlockSpec((d_in, d_h), lambda i: (0, 0)),      # w1: VMEM-resident
                pl.BlockSpec((1, d_h), lambda i: (0, 0)),         # b1
                pl.BlockSpec((d_h, d_h), lambda i: (0, 0)),       # w2: VMEM-resident
                pl.BlockSpec((1, d_h), lambda i: (0, 0)),         # b2
                pl.BlockSpec((d_h, d_out), lambda i: (0, 0)),     # w3
                pl.BlockSpec((1, d_out), lambda i: (0, 0)),       # b3
            ],
            out_specs=pl.BlockSpec((tb, d_out), lambda i: (i, 0)),
        ),
        compiler_params=pltpu.CompilerParams(
            dimension_semantics=("parallel",)),
        cost_estimate=cost,
    )(x, w1, b1, w2, b2, w3, b3)

    return out[:B]


def init_params(key):
    """Deterministic init matching nn.Linear shapes (stored as [in, out] for x @ W)."""
    k1, k2, k3, k4, k5, k6 = jax.random.split(key, 6)

    def uniform(k, shape, fan_in):
        bound = 1.0 / jnp.sqrt(fan_in)
        return jax.random.uniform(k, shape, jnp.float32, -bound, bound)

    w1 = uniform(k1, (8, 256), 8)
    b1 = uniform(k2, (1, 256), 8)
    w2 = uniform(k3, (256, 256), 256)
    b2 = uniform(k4, (1, 256), 256)
    w3 = uniform(k5, (256, 4), 256)
    b3 = uniform(k6, (1, 4), 256)
    return (w1, b1, w2, b2, w3, b3)


def reference_forward(x, params):
    # Pure-JAX reference; emulates the kernel's bf16 weight storage, f32 math.
    w1, b1, w2, b2, w3, b3 = params
    w1 = w1.astype(jnp.bfloat16).astype(jnp.float32)
    w2 = w2.astype(jnp.bfloat16).astype(jnp.float32)
    w3 = w3.astype(jnp.bfloat16).astype(jnp.float32)
    h = jnp.tanh(x @ w1 + b1)
    h = jnp.tanh(h @ w2 + b2)
    return jax.nn.softmax(h @ w3 + b3, axis=-1)


# TODO(synk): save_checkpoint / load_checkpoint are host-side file I/O and have
# no Pallas equivalent; they are intentionally not implemented here.

if __name__ == "__main__":
    key = jax.random.PRNGKey(0)
    pkey, xkey = jax.random.split(key)
    params = init_params(pkey)

    # Small primary test (single grid step).
    x_small = jax.random.normal(xkey, (8, 8), jnp.float32)  # state dim = 8
    out_small = jax.block_until_ready(policy_gradient_network(x_small, params))
    ref_small = reference_forward(x_small, params)
    assert out_small.shape == (8, 4)
    assert jnp.allclose(jnp.sum(out_small, axis=-1), 1.0, atol=1e-2)
    assert jnp.allclose(out_small, ref_small, atol=2e-2, rtol=2e-2)

    # Exercise the parallel batch grid + padding path (B=40, tile=16 -> grid 3).
    x_big = jax.random.normal(jax.random.PRNGKey(1), (40, 8), jnp.float32)
    out_big = jax.block_until_ready(policy_gradient_network(x_big, params, tb=16))
    ref_big = reference_forward(x_big, params)
    assert out_big.shape == (40, 4)
    assert jnp.allclose(jnp.sum(out_big, axis=-1), 1.0, atol=1e-2)
    assert jnp.allclose(out_big, ref_big, atol=2e-2, rtol=2e-2)

    print("KERNEL_OK")
</pallas_src>

<mosaic_0001>
module attributes {stable_mosaic.version = 11 : i64} {
  func.func @policy_net_kernel(%arg0: i32, %arg1: memref<8x8xf32, #tpu.memory_space<vmem>>, %arg2: memref<8x256xbf16, #tpu.memory_space<vmem>>, %arg3: memref<1x256xf32, #tpu.memory_space<vmem>>, %arg4: memref<256x256xbf16, #tpu.memory_space<vmem>>, %arg5: memref<1x256xf32, #tpu.memory_space<vmem>>, %arg6: memref<256x4xbf16, #tpu.memory_space<vmem>>, %arg7: memref<1x4xf32, #tpu.memory_space<vmem>>, %arg8: memref<8x4xf32, #tpu.memory_space<vmem>>) attributes {dimension_semantics = [#tpu.dimension_semantics<parallel>], iteration_bounds = array<i64: 1>, scalar_prefetch = 0 : i64, scratch_operands = 0 : i64, tpu.core_type = #tpu.core_type<tc>, window_params = [{transform_indices = @transform_0, window_bounds = array<i64: 8, 8>}, {pipeline_mode = #tpu.pipeline_mode<synchronous>, transform_indices = @transform_1, window_bounds = array<i64: 8, 256>}, {pipeline_mode = #tpu.pipeline_mode<synchronous>, transform_indices = @transform_2, window_bounds = array<i64: 1, 256>}, {pipeline_mode = #tpu.pipeline_mode<synchronous>, transform_indices = @transform_3, window_bounds = array<i64: 256, 256>}, {pipeline_mode = #tpu.pipeline_mode<synchronous>, transform_indices = @transform_4, window_bounds = array<i64: 1, 256>}, {pipeline_mode = #tpu.pipeline_mode<synchronous>, transform_indices = @transform_5, window_bounds = array<i64: 256, 4>}, {pipeline_mode = #tpu.pipeline_mode<synchronous>, transform_indices = @transform_6, window_bounds = array<i64: 1, 4>}, {transform_indices = @transform_7, window_bounds = array<i64: 8, 4>}]} {
    %c0 = arith.constant 0 : index
    %c0_0 = arith.constant 0 : index
    %0 = vector.load %arg1[%c0, %c0_0] : memref<8x8xf32, #tpu.memory_space<vmem>>, vector<8x8xf32>
    %1 = arith.truncf %0 : vector<8x8xf32> to vector<8x8xbf16>
    %c0_1 = arith.constant 0 : index
    %c0_2 = arith.constant 0 : index
    %2 = vector.load %arg2[%c0_1, %c0_2] : memref<8x256xbf16, #tpu.memory_space<vmem>>, vector<8x256xbf16>
    %cst = arith.constant dense<0.000000e+00> : vector<8x256xf32>
    %3 = tpu.matmul %1, %2, %cst {dimension_numbers = #tpu.dot_dimension_numbers<[1], [0], [0], [1], [0, 0, 1, 1], [], []>} : vector<8x8xbf16>, vector<8x256xbf16>, vector<8x256xf32> -> vector<8x256xf32>
    %c0_3 = arith.constant 0 : index
    %c0_4 = arith.constant 0 : index
    %4 = vector.load %arg3[%c0_3, %c0_4] : memref<1x256xf32, #tpu.memory_space<vmem>>, vector<1x256xf32>
    %5 = vector.broadcast %4 : vector<1x256xf32> to vector<8x256xf32>
    %6 = arith.addf %3, %5 : vector<8x256xf32>
    %7 = math.tanh %6 : vector<8x256xf32>
    %8 = arith.truncf %7 : vector<8x256xf32> to vector<8x256xbf16>
    %c0_5 = arith.constant 0 : index
    %c0_6 = arith.constant 0 : index
    %9 = vector.load %arg4[%c0_5, %c0_6] : memref<256x256xbf16, #tpu.memory_space<vmem>>, vector<256x256xbf16>
    %cst_7 = arith.constant dense<0.000000e+00> : vector<8x256xf32>
    %10 = tpu.matmul %8, %9, %cst_7 {dimension_numbers = #tpu.dot_dimension_numbers<[1], [0], [0], [1], [0, 0, 1, 1], [], []>} : vector<8x256xbf16>, vector<256x256xbf16>, vector<8x256xf32> -> vector<8x256xf32>
    %c0_8 = arith.constant 0 : index
    %c0_9 = arith.constant 0 : index
    %11 = vector.load %arg5[%c0_8, %c0_9] : memref<1x256xf32, #tpu.memory_space<vmem>>, vector<1x256xf32>
    %12 = vector.broadcast %11 : vector<1x256xf32> to vector<8x256xf32>
    %13 = arith.addf %10, %12 : vector<8x256xf32>
    %14 = math.tanh %13 : vector<8x256xf32>
    %15 = arith.truncf %14 : vector<8x256xf32> to vector<8x256xbf16>
    %c0_10 = arith.constant 0 : index
    %c0_11 = arith.constant 0 : index
    %16 = vector.load %arg6[%c0_10, %c0_11] : memref<256x4xbf16, #tpu.memory_space<vmem>>, vector<256x4xbf16>
    %cst_12 = arith.constant dense<0.000000e+00> : vector<8x4xf32>
    %17 = tpu.matmul %15, %16, %cst_12 {dimension_numbers = #tpu.dot_dimension_numbers<[1], [0], [0], [1], [0, 0, 1, 1], [], []>} : vector<8x256xbf16>, vector<256x4xbf16>, vector<8x4xf32> -> vector<8x4xf32>
    %c0_13 = arith.constant 0 : index
    %c0_14 = arith.constant 0 : index
    %18 = vector.load %arg7[%c0_13, %c0_14] : memref<1x4xf32, #tpu.memory_space<vmem>>, vector<1x4xf32>
    %19 = vector.broadcast %18 : vector<1x4xf32> to vector<8x4xf32>
    %20 = arith.addf %17, %19 : vector<8x4xf32>
    %cst_15 = arith.constant dense<0xFF800000> : vector<8xf32>
    %21 = vector.multi_reduction <maximumf>, %20, %cst_15 [1] : vector<8x4xf32> to vector<8xf32>
    %22 = vector.shape_cast %21 : vector<8xf32> to vector<8x1xf32>
    %23 = vector.broadcast %22 : vector<8x1xf32> to vector<8x4xf32>
    %24 = arith.subf %20, %23 : vector<8x4xf32>
    %25 = math.exp %24 : vector<8x4xf32>
    %cst_16 = arith.constant dense<0.000000e+00> : vector<8xf32>
    %26 = vector.multi_reduction <add>, %25, %cst_16 [1] : vector<8x4xf32> to vector<8xf32>
    %27 = vector.shape_cast %26 : vector<8xf32> to vector<8x1xf32>
    %28 = tpu.reciprocal %27 {approx = true} : vector<8x1xf32> -> vector<8x1xf32>
    %29 = vector.broadcast %28 : vector<8x1xf32> to vector<8x4xf32>
    %30 = arith.mulf %25, %29 : vector<8x4xf32>
    %c0_17 = arith.constant 0 : index
    %c0_18 = arith.constant 0 : index
    %31 = vector.load %arg8[%c0_17, %c0_18] : memref<8x4xf32, #tpu.memory_space<vmem>>, vector<8x4xf32>
    tpu.vector_store %arg8[%c0_17, %c0_18], %30 {strides = array<i32>} : memref<8x4xf32, #tpu.memory_space<vmem>>, vector<8x4xf32>,
    return
  }
  func.func @transform_0(%arg0: i32) -> (i32, i32) {
    %c0_i32 = arith.constant 0 : i32
    %c0_i32_0 = arith.constant 0 : i32
    return %arg0, %c0_i32 : i32, i32
  }
  func.func @transform_1(%arg0: i32) -> (i32, i32) {
    %c0_i32 = arith.constant 0 : i32
    %c0_i32_0 = arith.constant 0 : i32
    %c0_i32_1 = arith.constant 0 : i32
    return %c0_i32, %c0_i32_0 : i32, i32
  }
  func.func @transform_2(%arg0: i32) -> (i32, i32) {
    %c0_i32 = arith.constant 0 : i32
    %c0_i32_0 = arith.constant 0 : i32
    %c0_i32_1 = arith.constant 0 : i32
    return %c0_i32, %c0_i32_0 : i32, i32
  }
  func.func @transform_3(%arg0: i32) -> (i32, i32) {
    %c0_i32 = arith.constant 0 : i32
    %c0_i32_0 = arith.constant 0 : i32
    %c0_i32_1 = arith.constant 0 : i32
    return %c0_i32, %c0_i32_0 : i32, i32
  }
  func.func @transform_4(%arg0: i32) -> (i32, i32) {
    %c0_i32 = arith.constant 0 : i32
    %c0_i32_0 = arith.constant 0 : i32
    %c0_i32_1 = arith.constant 0 : i32
    return %c0_i32, %c0_i32_0 : i32, i32
  }
  func.func @transform_5(%arg0: i32) -> (i32, i32) {
    %c0_i32 = arith.constant 0 : i32
    %c0_i32_0 = arith.constant 0 : i32
    %c0_i32_1 = arith.constant 0 : i32
    return %c0_i32, %c0_i32_0 : i32, i32
  }
  func.func @transform_6(%arg0: i32) -> (i32, i32) {
    %c0_i32 = arith.constant 0 : i32
    %c0_i32_0 = arith.constant 0 : i32
    %c0_i32_1 = arith.constant 0 : i32
    return %c0_i32, %c0_i32_0 : i32, i32
  }
  func.func @transform_7(%arg0: i32) -> (i32, i32) {
    %c0_i32 = arith.constant 0 : i32
    %c0_i32_0 = arith.constant 0 : i32
    return %arg0, %c0_i32 : i32, i32
  }
}

</mosaic_0001>

<bundles_post_ra>
// kernel: tpu_custom_call.1
= control target key start
LH: loop header
LB: loop body
LE: loop exit
PB: predicated region body
PF: predicated region fallthrough
CT: control target
= control target key end

     0   :  { %12 = vsyncpa [#allocation3], 0  ;;  %s738_s24 = smov [#allocation2]   ;;  %s854_s0 = inlined_call_operand.vmem [shape: f32[8,8], index: 0, kind: input, shape index: {}]   ;;  %s855_s1 = inlined_call_operand.vmem [shape: bf16[8,256], index: 1, kind: input, shape index: {}]   ;;  %s856_s2 = inlined_call_operand.vmem [shape: f32[1,256], index: 2, kind: input, shape index: {}]   ;;  %s857_s3 = inlined_call_operand.hbm [shape: bf16[256,256], index: 3, kind: input, shape index: {}]   ;;  %s858_s4 = inlined_call_operand.vmem [shape: f32[1,256], index: 4, kind: input, shape index: {}]   ;;  %s859_s5 = inlined_call_operand.vmem [shape: bf16[256,4], index: 5, kind: input, shape index: {}]   ;;  %s860_s6 = inlined_call_operand.vmem [shape: f32[1,4], index: 6, kind: input, shape index: {}]   ;;  %s861_s7 = inlined_call_operand.vmem [shape: f32[8,4], index: 7, kind: output, shape index: {}]  }
   0x1   :  { %s24_s25 = sshll.u32 %s738_s24, 4  ;;  %s25_s25 = int_to_ptr.vmem [resolvable:$true] %s24_s25 }
   0x2   :  { %s724_s26 = scalar_lea.vmem %s25_s25, 4096  ;;  %p729_p1 = scmp.lt.s32.totalorder %s25_s25, %s25_s25 }
   0x3   :  { %p725_p0 = scmp.ne.s32.totalorder %s25_s25, %s724_s26  ;;  %p730_p2 = scmp.lt.s32.totalorder %s724_s26, %s724_s26 }
   0x5   :  { %p731_p3 = por %p730_p2, %p729_p1 }
   0x7   :  { %p732_p4 = pnand %p731_p3, %p725_p0 }
   0x9   :  { %735 = shalt.err (!%p732_p4)
}
   0xa   :  { %s739_s27 = smov 128   ;;  %s740_s28 = smov 8  }
   0xb   :  { %30 = dma.hbm_to_vmem [thread:$0]  %s857_s3, 4096, %s25_s25, [#allocation3], %s739_s27, %s739_s27, %s740_s28  }
   0xc   :  { %736 = dma.done.wait [#allocation3], 4096  }
   0xd   :  { %737 = vsyncadd [#allocation3], 4294963200  ;;  %v741_v0 = vmov 0   ;;  %v43_v1 = vld [vmem:[%s855_s1] sm:$0xff]  ;;  %vm65_vm0 = vcmask 1043456   ;;  %vm61_vm1 = vcmask 64512   ;;  %v46_v45 = vlaneseq }
   0xe   :  { %104 = vmatprep.mubr.bf16.mxu0 %v741_v0  ;;  %v41_v2 = vld [vmem:[%s854_s0] sm:$0xff]  ;;  %v560_v3 = vcombine.high %v43_v1, %v43_v1  ;;  %v559_v4 = vcombine.low %v43_v1, %v43_v1  ;;  %v640_v5 = vld [vmem:[#allocation2 + $0x74] ss:$8 sps:$4 sm:$0xff]   ;;  %v642_v6 = vld [vmem:[#allocation2 + $0x70] ss:$8 sps:$4 sm:$0xff]   ;;  %vm541_vm2 = vcmask 31744  }
   0xf   :  { %v643_v7 = vld [vmem:[#allocation2 + $0x64] ss:$8 sps:$4 sm:$0xff]   ;;  %v42_v9 = vpack.c.bf16 %v41_v2, %v41_v2  ;;  %321 = vmatprep.subr.bf16.mxu1 %v640_v5  ;;  %v645_v10 = vld [vmem:[#allocation2 + $0x60] ss:$8 sps:$4 sm:$0xff]   ;;  %v646_v11 = vld [vmem:[#allocation2 + $0x54] ss:$8 sps:$4 sm:$0xff]  }
  0x10   :  { %561 = vmatprep.subr.msk.bf16.mxu0 %vm65_vm0, %v560_v3  ;;  %v67_v8 = vsel %vm65_vm0, %v559_v4, 0  ;;  %322 = vmatpush1.bf16.msra.mxu1 %v642_v6  ;;  %v648_v12 = vld [vmem:[#allocation2 + $0x50] ss:$8 sps:$4 sm:$0xff]   ;;  %v649_v13 = vld [vmem:[#allocation2 + $0x44] ss:$8 sps:$4 sm:$0xff]   ;;  %v47_v46 = vshrl.u32 %v46_v45, 7 }
  0x11   :  { %87 = vmatpush1.bf16.msra.mxu0 %v67_v8  ;;  %323 = vmatprep.subr.bf16.mxu1 %v643_v7  ;;  %v651_v14 = vld [vmem:[#allocation2 + $0x40] ss:$8 sps:$4 sm:$0xff]   ;;  %v652_v15 = vld [vmem:[#allocation2 + $0x34] ss:$8 sps:$4 sm:$0xff]   ;;  %v654_v16 = vld [vmem:[#allocation2 + $0x30] ss:$8 sps:$4 sm:$0xff]  }
  0x12   :  { %v655_v17 = vld [vmem:[#allocation2 + $0x24] ss:$8 sps:$4 sm:$0xff]   ;;  %v657_v18 = vld [vmem:[#allocation2 + $0x20] ss:$8 sps:$4 sm:$0xff]   ;;  %v658_v19 = vld [vmem:[#allocation2 + $0x14] ss:$8 sps:$4 sm:$0xff]  }
  0x13   :  { %v660_v20 = vld [vmem:[#allocation2 + $0x10] ss:$8 sps:$4 sm:$0xff]   ;;  %v661_v21 = vld [vmem:[#allocation2 + $0x4] ss:$8 sps:$4 sm:$0xff]   ;;  %v663_v22 = vld [vmem:[#allocation2] ss:$8 sps:$4 sm:$0xff]  }
  0x14   :  { %562 = vmatmul.mubr.msk.bf16.vlgmr.msra.gmra.mxu0 %vm61_vm1, %v42_v9  ;;  %324 = vmatpush1.bf16.msra.mxu1 %v645_v10  ;;  %v664_v23 = vld [vmem:[#allocation2 + $0xf4] ss:$8 sps:$4 sm:$0xff]   ;;  %v666_v24 = vld [vmem:[#allocation2 + $0xf0] ss:$8 sps:$4 sm:$0xff]   ;;  %v667_v25 = vld [vmem:[#allocation2 + $0xe4] ss:$8 sps:$4 sm:$0xff]  }
  0x15   :  { %325 = vmatprep.subr.bf16.mxu1 %v646_v11  ;;  %v669_v26 = vld [vmem:[#allocation2 + $0xe0] ss:$8 sps:$4 sm:$0xff]   ;;  %v670_v27 = vld [vmem:[#allocation2 + $0xd4] ss:$8 sps:$4 sm:$0xff]   ;;  %v672_v28 = vld [vmem:[#allocation2 + $0xd0] ss:$8 sps:$4 sm:$0xff]  }
  0x16   :  { %v673_v29 = vld [vmem:[#allocation2 + $0xc4] ss:$8 sps:$4 sm:$0xff]   ;;  %v675_v30 = vld [vmem:[#allocation2 + $0xc0] ss:$8 sps:$4 sm:$0xff]   ;;  %v676_v31 = vld [vmem:[#allocation2 + $0xb4] ss:$8 sps:$4 sm:$0xff]  }
  0x17   :  { %v678_v32 = vld [vmem:[#allocation2 + $0xb0] ss:$8 sps:$4 sm:$0xff]   ;;  %v679_v33 = vld [vmem:[#allocation2 + $0xa4] ss:$8 sps:$4 sm:$0xff]   ;;  %v681_v34 = vld [vmem:[#allocation2 + $0xa0] ss:$8 sps:$4 sm:$0xff]  }
  0x18   :  { %326 = vmatpush1.bf16.msra.mxu1 %v648_v12  ;;  %v682_v35 = vld [vmem:[#allocation2 + $0x94] ss:$8 sps:$4 sm:$0xff]   ;;  %v684_v36 = vld [vmem:[#allocation2 + $0x90] ss:$8 sps:$4 sm:$0xff]   ;;  %v685_v37 = vld [vmem:[#allocation2 + $0x84] ss:$8 sps:$4 sm:$0xff]  }
  0x19   :  { %327 = vmatprep.subr.bf16.mxu1 %v649_v13  ;;  %v687_v38 = vld [vmem:[#allocation2 + $0x80] ss:$8 sps:$4 sm:$0xff]   ;;  %v688_v39 = vld [vmem:[%s859_s5 + $0x78] sm:$0xff]   ;;  %v690_v41 = vld [vmem:[%s859_s5 + $0x70] sm:$0xff]   ;;  %v48_v47 = vsub.s32 0, %v47_v46  ;;  %v52_v49 = vsub.s32 1, %v47_v46 }
  0x1a   :  { %v689_v40 = vld [vmem:[%s859_s5 + $0x38] sm:$0xff]   ;;  %612 = vmatprep.subr.bf16.mxu0 %v688_v39  ;;  %v691_v42 = vld [vmem:[%s859_s5 + $0x30] sm:$0xff]   ;;  %v692_v43 = vld [vmem:[%s859_s5 + $0x68] sm:$0xff]  }
  0x1b   :  { %613 = vmatpush3.bf16.msra.mxu0 %v689_v40  ;;  %v693_v44 = vld [vmem:[%s859_s5 + $0x28] sm:$0xff]   ;;  %v44_v48 = vld [vmem:[%s856_s2] sm:$0x3]  ;;  %v696_v0 = vld [vmem:[%s859_s5 + $0x58] sm:$0xff]  }
  0x1c   :  { %328 = vmatpush1.bf16.msra.mxu1 %v651_v14  ;;  %614 = vmatprep.subr.bf16.mxu0 %v690_v41  ;;  %v49_v50 = vrot.slane %v44_v48, %v48_v47  ;;  %v53_v51 = vrot.slane %v44_v48, %v52_v49  ;;  %v694_v62 = vld [vmem:[%s859_s5 + $0x60] sm:$0xff]   ;;  %v697_v1 = vld [vmem:[%s859_s5 + $0x18] sm:$0xff]   ;;  %v698_v2 = vld [vmem:[%s859_s5 + $0x50] sm:$0xff]  }
  0x1d   :  { %329 = vmatprep.subr.bf16.mxu1 %v652_v15  ;;  %v695_v63 = vld [vmem:[%s859_s5 + $0x20] sm:$0xff]   ;;  %v699_v3 = vld [vmem:[%s859_s5 + $0x10] sm:$0xff]   ;;  %v700_v4 = vld [vmem:[%s859_s5 + $0x48] sm:$0xff]  }
  0x1e   :  { %v701_v5 = vld [vmem:[%s859_s5 + $0x8] sm:$0xff]   ;;  %v702_v6 = vld [vmem:[%s859_s5 + $0x40] sm:$0xff]  }
  0x1f   :  { %615 = vmatpush3.bf16.msra.mxu0 %v691_v42  ;;  %v703_v7 = vld [vmem:[%s859_s5] sm:$0xff]  }
  0x20   :  { %330 = vmatpush1.bf16.msra.mxu1 %v654_v16  ;;  %616 = vmatprep.subr.bf16.mxu0 %v692_v43  ;;  %v149_v8 = vld [vmem:[%s858_s4] sm:$0x3] }
  0x21   :  { %331 = vmatprep.subr.bf16.mxu1 %v655_v17  ;;  %v154_v9 = vrot.slane %v149_v8, %v48_v47  ;;  %v158_v10 = vrot.slane %v149_v8, %v52_v49 }
  0x23   :  { %617 = vmatpush3.bf16.msra.mxu0 %v693_v44 }
  0x24   :  { %332 = vmatpush1.bf16.msra.mxu1 %v657_v18  ;;  %618 = vmatprep.subr.bf16.mxu0 %v694_v62 }
  0x25   :  { %333 = vmatprep.subr.bf16.mxu1 %v658_v19 }
  0x27   :  { %619 = vmatpush3.bf16.msra.mxu0 %v695_v63 }
  0x28   :  { %334 = vmatpush1.bf16.msra.mxu1 %v660_v20  ;;  %620 = vmatprep.subr.bf16.mxu0 %v696_v0 }
  0x29   :  { %335 = vmatprep.subr.bf16.mxu1 %v661_v21 }
  0x2b   :  { %621 = vmatpush3.bf16.msra.mxu0 %v697_v1 }
  0x2c   :  { %336 = vmatpush1.bf16.msra.mxu1 %v663_v22  ;;  %622 = vmatprep.subr.bf16.mxu0 %v698_v2 }
  0x2d   :  { %337 = vmatprep.subr.bf16.mxu1 %v664_v23  ;;  %v595_v23 = vld [vmem:[%s860_s6] ss:$0 sm:$0xff] }
  0x2f   :  { %623 = vmatpush3.bf16.msra.mxu0 %v699_v3 }
  0x30   :  { %338 = vmatpush2.bf16.msra.mxu1 %v666_v24  ;;  %624 = vmatprep.subr.bf16.mxu0 %v700_v4 }
  0x31   :  { %339 = vmatprep.subr.bf16.mxu1 %v667_v25 }
  0x33   :  { %625 = vmatpush3.bf16.msra.mxu0 %v701_v5 }
  0x34   :  { %340 = vmatpush2.bf16.msra.mxu1 %v669_v26  ;;  %626 = vmatprep.subr.bf16.mxu0 %v702_v6 }
  0x35   :  { %341 = vmatprep.subr.bf16.mxu1 %v670_v27 }
  0x37   :  { %627 = vmatpush3.bf16.msra.mxu0 %v703_v7 }
  0x38   :  { %342 = vmatpush2.bf16.msra.mxu1 %v672_v28 }
  0x39   :  { %343 = vmatprep.subr.bf16.mxu1 %v673_v29 }
  0x3c   :  { %344 = vmatpush2.bf16.msra.mxu1 %v675_v30 }
  0x3d   :  { %345 = vmatprep.subr.bf16.mxu1 %v676_v31 }
  0x40   :  { %346 = vmatpush2.bf16.msra.mxu1 %v678_v32 }
  0x41   :  { %347 = vmatprep.subr.bf16.mxu1 %v679_v33 }
  0x44   :  { %348 = vmatpush2.bf16.msra.mxu1 %v681_v34 }
  0x45   :  { %349 = vmatprep.subr.bf16.mxu1 %v682_v35 }
  0x48   :  { %350 = vmatpush2.bf16.msra.mxu1 %v684_v36 }
  0x49   :  { %351 = vmatprep.subr.bf16.mxu1 %v685_v37 }
  0x4c   :  { %352 = vmatpush2.bf16.msra.mxu1 %v687_v38 }
  0xd4   :  { %v106_v52 = vpop.f32.mrf.mxu0 }
  0xd5   :  { %v107_v53 = vadd.f32 %v106_v52, %v49_v50 }
  0xd6   :  { %v108_v54 = vpop.f32.mrf.mxu0 }
  0xd7   :  { %v109_v55 = vadd.f32 %v108_v54, %v53_v51  ;;  %704 = vtanh.f32 %v107_v53 }
  0xd8   :  { %v110_v56 = vpop.f32.mrf.mxu0 }
  0xd9   :  { %706 = vtanh.f32 %v109_v55 }
  0xda   :  { %v111_v57 = vpop.f32.mrf.mxu0 }
  0xe4   :  { %v705_v58 = vpop.eup %704 }
  0xe5   :  { %v115_v61 = vpack.c.bf16 %v705_v58, %v705_v58 }
  0xe6   :  { %v707_v59 = vpop.eup %706 }
  0xe7   :  { %v116_v60 = vpack.c.bf16 %v707_v59, %v707_v59 }
  0xe9   :  { %353 = vmatprep.mubr.bf16.mxu1 %v116_v60 }
  0xea   :  { %354 = vmatmul.mubr.bf16.vlgmr.msra.gmra.mxu1 %v115_v61 }
 0x1aa   :  { %v355_v11 = vpop.f32.mrf.mxu1 }
 0x1ab   :  { %v356_v12 = vadd.f32 %v355_v11, %v154_v9 }
 0x1ac   :  { %v357_v13 = vpop.f32.mrf.mxu1 }
 0x1ad   :  { %v358_v14 = vadd.f32 %v357_v13, %v158_v10  ;;  %708 = vtanh.f32 %v356_v12 }
 0x1ae   :  { %v359_v15 = vpop.f32.mrf.mxu1 }
 0x1af   :  { %710 = vtanh.f32 %v358_v14 }
 0x1b0   :  { %v360_v16 = vpop.f32.mrf.mxu1 }
 0x1ba   :  { %v709_v17 = vpop.eup %708 }
 0x1bb   :  { %v364_v20 = vpack.c.bf16 %v709_v17, %v709_v17 }
 0x1bc   :  { %v711_v18 = vpop.eup %710 }
 0x1bd   :  { %v365_v19 = vpack.c.bf16 %v711_v18, %v711_v18 }
 0x1bf   :  { %533 = vmatprep.mubr.bf16.mxu0 %v365_v19 }
 0x1c0   :  { %534 = vmatmul.mubr.bf16.vlgmr.msra.gmra.mxu0 %v364_v20 }
 0x280   :  { %v628_v21 = vpop.f32.mrf.mxu0 }
 0x282   :  { %v629_v22 = vpop.f32.mrf.mxu0 }
 0x283   :  { %v630_v24 = vadd.f32 %v629_v22, %v628_v21 }
 0x284   :  { %v631_v25 = vpop.f32.mrf.mxu0 }
 0x285   :  { %v536_v26 = vadd.f32 %v630_v24, %v595_v23 }
 0x286   :  { %v632_v27 = vpop.f32.mrf.mxu0 }
 0x287   :  { %v542_v28 = vsel %vm541_vm2, %v536_v26, -inf }
 0x288   :  { %543 = vmax.xlane.f32.xlu0 %v542_v28 }
 0x311   :  { %v544_v29 = vpop.xlane.xlu0 %543 }
 0x312   :  { %v545_v30 = vsub.f32 %v536_v26, %v544_v29 }
 0x314   :  { %v546_v31 = vmul.f32 1.442695, %v545_v30 }
 0x316   :  { %712 = vpow2.f32 %v546_v31 }
 0x323   :  { %v713_v32 = vpop.eup %712 }
 0x324   :  { %v548_v33 = vsel %vm541_vm2, %v713_v32, 0.0 }
 0x325   :  { %549 = vadd.xlane.f32.xlu0 %v548_v33 }
 0x3ae   :  { %v550_v34 = vpop.xlane.xlu0 %549 }
 0x3af   :  { %714 = vrcp.f32 %v550_v34 }
 0x3bc   :  { %v715_v35 = vpop.eup %714 }
 0x3bd   :  { %v552_v36 = vmul.f32 %v715_v35, %v713_v32 }
 0x3bf   :  { %553 = vst.msk [vmem:[%s861_s7] sm:$0xff] %vm541_vm2, %v552_v36 }
 0x3c0   :  { %558 = vsyncpa [#allocation3], 1 }

</bundles_post_ra>
